<compile_context>
chip_gen: v7x
topology: tpu7x:2x2x1
jax: 0.10.0
libtpu: 0.0.40
codegen_flags: <defaults>
</compile_context>

<pallas_src>
import functools

import jax
import jax.numpy as jnp
from jax import lax
from jax.experimental import pallas as pl
from jax.experimental.pallas import tpu as pltpu


def _shift_crop_kernel(shift_ref, x_ref, o_ref, *, pad, block_b):
    """Fused replicate-pad + per-batch shifted crop for one batch block.

    shift_ref: (2*N,) int32 in SMEM (scalar prefetch), [2n] = x shift (W),
               [2n+1] = y shift (H), each nominally in [0, 2*pad].
    x_ref    : (block_b, C, H, W) VMEM input block (auto-pipelined).
    o_ref    : (block_b, C, H, W) VMEM output block (auto-pipelined).
    """
    g = pl.program_id(0)
    _, c, h, w = x_ref.shape
    acc_t = jnp.float32

    # Batch-independent iotas, hoisted out of the per-batch loop
    # (JAX does not CSE broadcast_in_dim).
    ii = lax.broadcasted_iota(jnp.int32, (h, h), 0)  # output row i
    kk = lax.broadcasted_iota(jnp.int32, (h, h), 1)  # source row k
    ll = lax.broadcasted_iota(jnp.int32, (w, w), 0)  # source col l
    jj = lax.broadcasted_iota(jnp.int32, (w, w), 1)  # output col j

    # Folding (C, H, W) -> (C*H, W) is a layout-preserving reshape only when H
    # packs whole f32 sublane tiles (8 rows / vreg).  Otherwise fall back to
    # the per-channel batched column select (proven lowering path).
    fold_cols = (h % 8 == 0)

    def one_batch(b, carry):
        n = g * block_b + b
        dx = shift_ref[2 * n + 0] - pad  # column shift, in [-pad, pad]
        dy = shift_ref[2 * n + 1] - pad  # row shift,    in [-pad, pad]

        # One-hot selection matrices implementing the clamped (replicate-pad)
        # gather:  rs[i, k] = 1 iff k == clamp(i + dy, 0, H-1)
        #          cs[l, j] = 1 iff l == clamp(j + dx, 0, W-1)
        # Entries are exact {0, 1}; the matmuls below are exact at HIGHEST.
        rs = (kk == jnp.clip(ii + dy, 0, h - 1)).astype(acc_t)  # (H, H)
        cs = (ll == jnp.clip(jj + dx, 0, w - 1)).astype(acc_t)  # (W, W)

        xb = x_ref[b]  # (C, H, W)

        # Row select: t[c, i, j] = x[c, clamp(i + dy), j].
        t = jnp.einsum(
            "cik,ckj->cij", jnp.broadcast_to(rs, (c, h, h)), xb,
            preferred_element_type=jnp.float32,
            precision=lax.Precision.HIGHEST,
        )

        # Column select: out[c, i, j] = t[c, i, clamp(j + dx)].
        if fold_cols:
            # ONE tall (C*H, W) x (W, W) matmul — selection matrix is pushed
            # to the MXU once per batch, far better occupancy than C tiny
            # per-channel matmuls.
            yb = jnp.dot(
                t.reshape(c * h, w), cs,
                preferred_element_type=jnp.float32,
                precision=lax.Precision.HIGHEST,
            ).reshape(c, h, w)
        else:
            yb = jnp.einsum(
                "cil,clj->cij", t, jnp.broadcast_to(cs, (c, w, w)),
                preferred_element_type=jnp.float32,
                precision=lax.Precision.HIGHEST,
            )

        o_ref[b] = yb.astype(o_ref.dtype)
        return carry

    if block_b == 1:
        one_batch(0, 0)  # static index, no loop machinery needed
    else:
        # Visible loop (not a Python unroll) -> bounded live ranges, no
        # block_b-way replication of rs/cs/t/yb spilling to VMEM.
        lax.fori_loop(0, block_b, one_batch, 0)


def _pick_batch_block(n, plane_bytes, *, cap=8, vmem_budget=24 * 1024 * 1024):
    """Batches per grid step.

    Constraints: divides n; double-buffered in+out working set
    (~4 * block_b * plane_bytes) stays within `vmem_budget` (safe on v7x's
    64 MiB VMEM); and prefer a grid of >= 2 steps so the "parallel" axis can
    be sharded across v7x's two TensorCores.
    """
    cap = max(1, min(cap, vmem_budget // max(1, 4 * plane_bytes)))
    divisors = [b for b in range(1, min(cap, n) + 1) if n % b == 0]
    multi_step = [b for b in divisors if n // b >= 2]
    pool = multi_step if multi_step else divisors
    return max(pool)


def random_shifts_aug(x, shift, pad):
    """x: (N, C, H, W) float32, shift: (N, 2) int32 in [0, 2*pad]."""
    n, c, h, w = x.shape
    assert h == w
    itemsize = x.dtype.itemsize
    plane_bytes = c * h * w * itemsize
    block_b = _pick_batch_block(n, plane_bytes)

    kernel = functools.partial(_shift_crop_kernel, pad=pad, block_b=block_b)
    out = pl.pallas_call(
        kernel,
        out_shape=jax.ShapeDtypeStruct((n, c, h, w), x.dtype),
        grid_spec=pltpu.PrefetchScalarGridSpec(
            num_scalar_prefetch=1,  # flat (2N,) shift lands in SMEM
            grid=(n // block_b,),
            in_specs=[
                pl.BlockSpec((block_b, c, h, w), lambda g, s: (g, 0, 0, 0)),
            ],
            out_specs=pl.BlockSpec((block_b, c, h, w), lambda g, s: (g, 0, 0, 0)),
        ),
        compiler_params=pltpu.CompilerParams(
            dimension_semantics=("parallel",),   # batch blocks independent
            vmem_limit_bytes=48 * 1024 * 1024,   # <= v7x 64 MiB physical VMEM
        ),
        cost_estimate=pl.CostEstimate(
            flops=0,                              # memory-bound shifted copy
            transcendentals=0,
            bytes_accessed=2 * n * c * h * w * itemsize,
        ),
    )(shift.reshape(-1).astype(jnp.int32), x)
    return out


def _reference(x, shift, pad):
    """Pure-JAX reference of the exact RandomShiftsAug semantics."""
    n, c, h, w = x.shape
    xpad = jnp.pad(x, ((0, 0), (0, 0), (pad, pad), (pad, pad)), mode="edge")

    def one(xp_i, s_i):
        sx, sy = s_i[0], s_i[1]
        return jax.lax.dynamic_slice(xp_i, (0, sy, sx), (c, h, w))

    return jax.vmap(one)(xpad, shift)


if __name__ == "__main__":
    pad = 4
    N, C, H, W = 2, 4, 16, 16

    key = jax.random.PRNGKey(0)
    kx, ks = jax.random.split(key)
    x = jax.random.normal(kx, (N, C, H, W), dtype=jnp.float32)
    # TODO(synk): the torch module samples the shift internally with
    # torch.randint; here it is an explicit int32 input drawn with JAX RNG
    # over the same range [0, 2*pad].
    shift = jax.random.randint(ks, (N, 2), 0, 2 * pad + 1, dtype=jnp.int32)

    out = jax.block_until_ready(random_shifts_aug(x, shift, pad))
    ref = _reference(x, shift, pad)

    assert out.shape == (N, C, H, W)
    assert out.dtype == x.dtype
    err = float(jnp.max(jnp.abs(out - ref)))
    assert err <= 1e-6, f"max abs err vs reference: {err}"

    print("KERNEL_OK")
</pallas_src>

<mosaic_0001>
module attributes {stable_mosaic.version = 11 : i64} {
  func.func @_shift_crop_kernel(%arg0: i32, %arg1: memref<4xi32, #tpu.memory_space<smem>>, %arg2: memref<1x4x16x16xf32, #tpu.memory_space<vmem>>, %arg3: memref<1x4x16x16xf32, #tpu.memory_space<vmem>>) attributes {dimension_semantics = [#tpu.dimension_semantics<parallel>], iteration_bounds = array<i64: 2>, scalar_prefetch = 1 : i64, scratch_operands = 0 : i64, tpu.core_type = #tpu.core_type<tc>, window_params = [{transform_indices = @transform_0, window_bounds = array<i64: 1, 4, 16, 16>}, {transform_indices = @transform_1, window_bounds = array<i64: 1, 4, 16, 16>}]} {
    %0 = tpu.iota {dimensions = array<i32: 0>} : vector<16x16xi32>
    %1 = tpu.iota {dimensions = array<i32: 1>} : vector<16x16xi32>
    %2 = tpu.iota {dimensions = array<i32: 0>} : vector<16x16xi32>
    %3 = tpu.iota {dimensions = array<i32: 1>} : vector<16x16xi32>
    %c1_i32 = arith.constant 1 : i32
    %4 = arith.muli %arg0, %c1_i32 : i32
    %c0_i32 = arith.constant 0 : i32
    %5 = arith.addi %4, %c0_i32 : i32
    %c2_i32 = arith.constant 2 : i32
    %6 = arith.muli %c2_i32, %5 : i32
    %c0_i32_0 = arith.constant 0 : i32
    %7 = arith.addi %6, %c0_i32_0 : i32
    %8 = arith.index_cast %7 : i32 to index
    %9 = memref.load %arg1[%8] : memref<4xi32, #tpu.memory_space<smem>>
    %c4_i32 = arith.constant 4 : i32
    %10 = arith.subi %9, %c4_i32 : i32
    %c2_i32_1 = arith.constant 2 : i32
    %11 = arith.muli %c2_i32_1, %5 : i32
    %c1_i32_2 = arith.constant 1 : i32
    %12 = arith.addi %11, %c1_i32_2 : i32
    %13 = arith.index_cast %12 : i32 to index
    %14 = memref.load %arg1[%13] : memref<4xi32, #tpu.memory_space<smem>>
    %c4_i32_3 = arith.constant 4 : i32
    %15 = arith.subi %14, %c4_i32_3 : i32
    %16 = vector.broadcast %15 : i32 to vector<16x16xi32>
    %17 = arith.addi %0, %16 : vector<16x16xi32>
    %c0_i32_4 = arith.constant 0 : i32
    %c15_i32 = arith.constant 15 : i32
    %18 = vector.broadcast %c0_i32_4 : i32 to vector<16x16xi32>
    %19 = arith.maxsi %18, %17 : vector<16x16xi32>
    %20 = vector.broadcast %c15_i32 : i32 to vector<16x16xi32>
    %21 = arith.minsi %20, %19 : vector<16x16xi32>
    %22 = arith.cmpi eq, %1, %21 : vector<16x16xi32>
    %23 = arith.extui %22 : vector<16x16xi1> to vector<16x16xi32>
    %24 = arith.sitofp %23 : vector<16x16xi32> to vector<16x16xf32>
    %25 = vector.broadcast %10 : i32 to vector<16x16xi32>
    %26 = arith.addi %3, %25 : vector<16x16xi32>
    %c0_i32_5 = arith.constant 0 : i32
    %c15_i32_6 = arith.constant 15 : i32
    %27 = vector.broadcast %c0_i32_5 : i32 to vector<16x16xi32>
    %28 = arith.maxsi %27, %26 : vector<16x16xi32>
    %29 = vector.broadcast %c15_i32_6 : i32 to vector<16x16xi32>
    %30 = arith.minsi %29, %28 : vector<16x16xi32>
    %31 = arith.cmpi eq, %2, %30 : vector<16x16xi32>
    %32 = arith.extui %31 : vector<16x16xi1> to vector<16x16xi32>
    %33 = arith.sitofp %32 : vector<16x16xi32> to vector<16x16xf32>
    %c0 = arith.constant 0 : index
    %c0_7 = arith.constant 0 : index
    %c0_8 = arith.constant 0 : index
    %c0_9 = arith.constant 0 : index
    %34 = vector.load %arg2[%c0, %c0_7, %c0_8, %c0_9] : memref<1x4x16x16xf32, #tpu.memory_space<vmem>>, vector<1x4x16x16xf32>
    %35 = vector.shape_cast %34 : vector<1x4x16x16xf32> to vector<4x16x16xf32>
    %36 = vector.shape_cast %24 : vector<16x16xf32> to vector<1x16x16xf32>
    %37 = vector.broadcast %36 : vector<1x16x16xf32> to vector<4x16x16xf32>
    "tpu.trace_start"() <{level = 10 : i32, message = "cik,ckj->cij"}> : () -> ()
    %cst = arith.constant dense<0.000000e+00> : vector<4x16x16xf32>
    %38 = tpu.matmul %37, %35, %cst {dimension_numbers = #tpu.dot_dimension_numbers<[2], [1], [1], [2], [0, 0, 0, 1, 1, 2], [0], [0]>, precision = #tpu.contract_precision<fp32>} : vector<4x16x16xf32>, vector<4x16x16xf32>, vector<4x16x16xf32> -> vector<4x16x16xf32>
    "tpu.trace_stop"() : () -> ()
    %39 = vector.shape_cast %38 : vector<4x16x16xf32> to vector<64x16xf32>
    %cst_10 = arith.constant dense<0.000000e+00> : vector<64x16xf32>
    %40 = tpu.matmul %39, %33, %cst_10 {dimension_numbers = #tpu.dot_dimension_numbers<[1], [0], [0], [1], [0, 0, 1, 1], [], []>, precision = #tpu.contract_precision<fp32>} : vector<64x16xf32>, vector<16x16xf32>, vector<64x16xf32> -> vector<64x16xf32>
    %41 = vector.shape_cast %40 : vector<64x16xf32> to vector<4x16x16xf32>
    %c0_11 = arith.constant 0 : index
    %c0_12 = arith.constant 0 : index
    %c0_13 = arith.constant 0 : index
    %c0_14 = arith.constant 0 : index
    %42 = vector.load %arg3[%c0_11, %c0_12, %c0_13, %c0_14] : memref<1x4x16x16xf32, #tpu.memory_space<vmem>>, vector<1x4x16x16xf32>
    %43 = vector.shape_cast %42 : vector<1x4x16x16xf32> to vector<4x16x16xf32>
    %44 = vector.shape_cast %41 : vector<4x16x16xf32> to vector<1x4x16x16xf32>
    tpu.vector_store %arg3[%c0_11, %c0_12, %c0_13, %c0_14], %44 {strides = array<i32>} : memref<1x4x16x16xf32, #tpu.memory_space<vmem>>, vector<1x4x16x16xf32>,
    return
  }
  func.func @transform_0(%arg0: i32, %arg1: memref<4xi32, #tpu.memory_space<smem>>) -> (i32, i32, i32, i32) {
    %c0_i32 = arith.constant 0 : i32
    %c0_i32_0 = arith.constant 0 : i32
    %c0_i32_1 = arith.constant 0 : i32
    %c0_i32_2 = arith.constant 0 : i32
    return %arg0, %c0_i32, %c0_i32_0, %c0_i32_1 : i32, i32, i32, i32
  }
  func.func @transform_1(%arg0: i32, %arg1: memref<4xi32, #tpu.memory_space<smem>>) -> (i32, i32, i32, i32) {
    %c0_i32 = arith.constant 0 : i32
    %c0_i32_0 = arith.constant 0 : i32
    %c0_i32_1 = arith.constant 0 : i32
    %c0_i32_2 = arith.constant 0 : i32
    return %arg0, %c0_i32, %c0_i32_0, %c0_i32_1 : i32, i32, i32, i32
  }
}

</mosaic_0001>

<bundles_post_ra>
// kernel: tpu_custom_call.1
= control target key start
LH: loop header
LB: loop body
LE: loop exit
PB: predicated region body
PF: predicated region fallthrough
CT: control target
= control target key end

     0   :  { %s4394_s0 = inlined_call_operand.hbm [shape: s32[4], index: 0, kind: input, shape index: {}]   ;;  %s4395_s1 = inlined_call_operand.hbm [shape: f32[2,4,16,16], index: 1, kind: input, shape index: {}]   ;;  %s4396_s2 = inlined_call_operand.hbm [shape: f32[2,4,16,16], index: 2, kind: output, shape index: {}]  }
   0x1   :  { %s3808_s11 = scalar_lea.hbm %s4394_s0, 16 }
   0x2   :  { %p3809_p0 = scmp.ne.s32.totalorder %s4394_s0, %s3808_s11  ;;  %p3812_p1 = scmp.lt.u32.totalorder %s3808_s11, %s4394_s0 }
   0x4   :  { %p3814_p2 = pnand %p3812_p1, %p3809_p0 }
   0x6   :  { %3817 = shalt.err (!%p3814_p2)  }
   0x7   :  { %s3918_s16 = smov [#allocation3]  }
   0x8   :  { %8 = dma.hbm_to_smem %s4394_s0, 16, %s3918_s16, [#allocation2] }
   0x9   :  { %3892 = dma.done.wait [#allocation2], 16 }
   0xa   :  { %3893 = vsyncadd [#allocation2], 4294967280 }
   0xb   :  { %10 = sfence }
   0xc   :  { %11 = vsyncpa [#allocation5], 0 }
   0xd   :  { %13 = vsyncpa [#allocation5 + $0x1], 0 }
   0xe   :  { %14 = vsyncpa [#allocation6], 0 }
   0xf   :  { %16 = vsyncpa [#allocation6 + $0x1], 0  ;;  %s3954_s19 = smov 0   ;;  %s3956_s20 = smov 0  }
  0x10   :  { %s3958_s21 = smov 0   ;;  %s3960_s22 = smov 0  }
  0x11 LB: > { %s3975_s0 = sadd.s32 4294967295, %s3916_s22   ;;  %s3082_s23 = sadd.s32 4294967294, %s3916_s22   ;;  %s3916_s22 = sphi %s3960_s22, %s4411_s22   ;;  %s3912_s21 = sphi %s3958_s21, %s4410_s21   ;;  %s3908_s20 = sphi %s3956_s20, %s4409_s20   ;;  %s3904_s19 = sphi %s3954_s19, %s4408_s19  }
  0x12   : > { %s3979_s24 = sadd.s32 1, %s3916_s22   ;;  %s29_s25 = sadd.s32 1, %s3912_s21 }
  0x13   : > { %s26_s26 = ssub.s32 %s3916_s22, %s3979_s24  ;;  %p36_p3 = scmp.ne.s32.totalorder %s3912_s21, %s3908_s20 }
  0x14   : > { %p27_p4 = scmp.eq.s32.totalorder %s26_s26, 0  ;;  %p37_p5 = scmp.eq.s32.totalorder %s3916_s22, 0 }
  0x15   : > { %p42_p6 = scmp.ne.s32.totalorder %s3908_s20, %s3904_s19  ;;  %p43_p7 = scmp.eq.s32.totalorder %s3975_s0, 0 }
  0x16   : > { %s3991_s27 = scalar_select %p27_p4, %s3912_s21, %s29_s25  }
  0x17   : > { %p3993_p8 = por %p37_p5, %p36_p3  ;;  %p3997_p9 = por %p43_p7, %p42_p6 }
  0x18   : > { %p66_p10 = scmp.eq.s32.totalorder %s3975_s0, 1  ;;  %p72_p11 = scmp.eq.s32.totalorder %s3082_s23, 1 }
  0x19   : > { %p3767_p13 = scmp.lt.s32.totalorder %s3916_s22, 2  ;;  %s92_s4 = sand.u32 1, %s3912_s21  }
  0x1a   : > { %p4004_p0 = por %p66_p10, %p36_p3  ;;  %p4008_p1 = por %p72_p11, %p42_p6 }
  0x1b   : > { %s3133_s5 = sshll.u32 %s3916_s22, 10  ;;  %s3085_s6 = sshll.u32 %s92_s4, 6 }
  0x1c   : > { %s4400_s30 = scalar_select %p4004_p0, 1, 0 }
  0x1d   : > { %s4401_s3 = scalar_select %p4008_p1, 1, 0 }
  0x1e   : > { %s4017_s9 = scalar_lea.hbm %s4395_s1, %s3133_s5  ;;  %s96_s10 = scalar_lea.vmem [#allocation4], %s3085_s6 }
  0x1f   : > { %s103_s11 = sshll.u32 %s96_s10, 4  ;;  %p4021_p2 = pnand %p3767_p13, %p3993_p8  ;;  %s4025_s11 = int_to_ptr.vmem [resolvable:$true] %s103_s11 }
  0x20   : > { %s4027_s13 = scalar_lea.sflag [#allocation5], %s92_s4  ;;  %s3818_s14 = scalar_lea.hbm %s4017_s9, 1024 }
  0x21   : > { %p3819_p3 = scmp.ne.s32.totalorder %s4017_s9, %s3818_s14  ;;  %p3820_p4 = pneg %p4021_p2 }
  0x22   : > { %s3823_s17 = scalar_lea.hbm %s4395_s1, 2048  ;;  %p3824_p7 = scmp.lt.u32.totalorder %s4017_s9, %s4395_s1 }
  0x23   : > { %p3821_p5 = pnand %p3820_p4, %p3819_p3  ;;  %p3825_p8 = scmp.lt.u32.totalorder %s3823_s17, %s3818_s14 }
  0x24   : > { %p3827_p11 = scmp.lt.u32.totalorder %s3818_s14, %s4017_s9 }
  0x25   : > { %p3822_p6 = pneg %p3821_p5  ;;  %p3826_p10 = por %p3825_p8, %p3824_p7 }
  0x27   : > { %p3828_p13 = por %p3827_p11, %p3826_p10 }
  0x29   : > { %p3829_p12 = pnand %p3828_p13, %p3822_p6 }
  0x2b   : > { %3832 = shalt.err (!%p3829_p12)
}
  0x2c   : > { %s3833_s25 = scalar_lea.vmem %s4025_s11, 1024  ;;  %s3919_s26 = smov [#allocation4]  }
  0x2d   : > { %p3834_p3 = scmp.ne.s32.totalorder %s4025_s11, %s3833_s25  ;;  %s3838_s28 = sshll.u32 %s3919_s26, 4  ;;  %s3839_s28 = int_to_ptr.vmem [resolvable:$false] %s3838_s28 }
  0x2e   : > { %s3840_s4 = scalar_lea.vmem %s3839_s28, 2048  ;;  %p3841_p0 = scmp.lt.s32.totalorder %s4025_s11, %s3839_s28 }
  0x2f   : > { %p3836_p5 = pnand %p3834_p3, %p3820_p4  ;;  %p3842_p7 = scmp.lt.s32.totalorder %s3840_s4, %s3833_s25 }
  0x31   : > { %p3837_p1 = pneg %p3836_p5  ;;  %p3843_p8 = por %p3842_p7, %p3841_p0 }
  0x33   : > { %p3844_p10 = pnand %p3843_p8, %p3837_p1 }
  0x35   : > { %3847 = shalt.err (!%p3844_p10)
}
  0x36   : > { %s3920_s5 = smov 128   ;;  %s3921_s6 = smov 8  }
  0x37   : > { %3762 = dma.hbm_to_vmem [thread:$0]  (!%p4021_p2), %s4017_s9, 1024, %s4025_s11, %s4027_s13, %s3920_s5, %s3920_s5, %s3921_s6  }
  0x38   : > { %p3088_p12 = scmp.ge.s32.totalorder %s3916_s22, 1  ;;  %p111_p4 = scmp.lt.s32.totalorder %s3916_s22, 3 }
  0x3a   : > { %p112_p6 = pnand %p3088_p12, %p111_p4 }
  0x3b   : > { %s4058_s7 = sand.u32 (!%p112_p6), 1, %s3908_s20  }
  0x3c   : > { %115 = sbr.rel (%p112_p6) target bundleno = 671 (0x29f), region = 24  ;;  %s3089_s8 = sshll.u32 (!%p112_p6), %s4058_s7, 6 }
  0x3d   : > { %s118_s10 = scalar_lea.sflag (!%p112_p6), [#allocation5], %s4058_s7  ;;  %s4064_s14 = scalar_lea.vmem (!%p112_p6), [#allocation4], %s3089_s8 }
  0x43   : > { %3895 = dma.done.wait (%p3997_p9), %s118_s10, 1024  }
  0x44   : > { %3897 = vsyncadd (%p3997_p9), %s118_s10, 4294966272  ;;  %v140_v0 = vlaneseq  ;;  %s3091_s9 = sshll.u32 %s3975_s0, 1  ;;  %v180_v2 = vld [vmem:[%s4064_s14] sm:$0xff]  ;;  %v181_v3 = vld [vmem:[%s4064_s14 + $0x8] sm:$0xff]  ;;  %vm188_vm0 = vcmask 130048   ;;  %v3922_v35 = vmov 0.0  }
  0x45   : > { %s148_s11 = sadd.s32 1, %s3091_s9  ;;  %v182_v4 = vld [vmem:[%s4064_s14 + $0x10] sm:$0xff]  ;;  %v196_v6 = vand.u32 4294901760, %v180_v2  ;;  %v199_v7 = vand.u32 4294901760, %v181_v3  ;;  %v183_v8 = vld [vmem:[%s4064_s14 + $0x18] sm:$0xff]  ;;  %v184_v56 = vld [vmem:[%s4064_s14 + $0x20] sm:$0xff] }
  0x46   : > { %s149_s12 = sld [smem:[#allocation3 + %s148_s11]]  ;;  %v4073_v1 = vshrl.u32 %v140_v0, 7  ;;  %v698_v9 = vand.u32 4294901760, %v182_v4  ;;  %v701_v10 = vand.u32 4294901760, %v183_v8  ;;  %v4097_v20 = vand.u32 127, %v140_v0  ;;  %v185_v57 = vld [vmem:[%s4064_s14 + $0x28] sm:$0xff] }
  0x47   : > { %v4082_v12 = vpack.c.bf16 %v199_v7, %v196_v6  ;;  %v4085_v14 = vsub.f32 %v180_v2, %v196_v6  ;;  %v4087_v15 = vsub.f32 %v181_v3, %v199_v7  ;;  %v186_v58 = vld [vmem:[%s4064_s14 + $0x30] sm:$0xff]  ;;  %v187_v59 = vld [vmem:[%s4064_s14 + $0x38] sm:$0xff]  ;;  %v1200_v60 = vand.u32 4294901760, %v184_v56  ;;  %s146_s13 = sld [smem:[#allocation3 + %s3091_s9]]  ;;  %s139_s16 = scalar_lea.vmem [#allocation7], %s3089_s8 }
  0x48   : > { %v4079_v5 = vadd.s32 8, %v4073_v1  ;;  %v4089_v16 = vpack.c.bf16 %v701_v10, %v698_v9  ;;  %v4092_v18 = vsub.f32 %v182_v4, %v698_v9  ;;  %v4094_v19 = vsub.f32 %v183_v8, %v701_v10  ;;  %s3134_s17 = sshll.u32 %s3975_s0, 10  ;;  %s3009_s18 = sshll.u32 %s139_s16, 4  ;;  %s4348_s18 = int_to_ptr.vmem [resolvable:$true] %s3009_s18 }
  0x49   : > { %3556 = vmatprep.subr.bf16.mxu0 %v4082_v12  ;;  %v285_v21 = vand.u32 4294901760, %v4085_v14  ;;  %v292_v22 = vand.u32 4294901760, %v4087_v15  ;;  %v3563_v52 = vpack.c.bf16 %v4087_v15, %v4085_v14  ;;  %v1203_v61 = vand.u32 4294901760, %v185_v57  ;;  %s4346_s26 = scalar_lea.hbm %s4396_s2, %s3134_s17  ;;  %s2996_s0 = scalar_lea.sflag [#allocation6], %s4058_s7 }
  0x4a   : > { %3558 = vmatpush3.bf16.msra.mxu0 %v4082_v12  ;;  %3580 = vmatprep.subr.bf16.mxu1 %v4089_v16  ;;  %v787_v24 = vand.u32 4294901760, %v4092_v18  ;;  %v794_v25 = vand.u32 4294901760, %v4094_v19  ;;  %v3587_v53 = vpack.c.bf16 %v4094_v19, %v4092_v18  ;;  %v1702_v62 = vand.u32 4294901760, %v186_v58  ;;  %s3848_s28 = scalar_lea.vmem %s4348_s18, 1024  ;;  %p4405_p0 = scmp.ne.s32.totalorder %s4400_s30, 0 }
  0x4b   : > { %3582 = vmatpush3.bf16.msra.mxu1 %v4089_v16  ;;  %v286_v26 = vsub.f32 %v4085_v14, %v285_v21  ;;  %v293_v27 = vsub.f32 %v4087_v15, %v292_v22  ;;  %v3571_v54 = vpack.c.bf16 %v292_v22, %v285_v21  ;;  %v1705_v63 = vand.u32 4294901760, %v187_v59  ;;  %p3849_p9 = scmp.ne.s32.totalorder %s4348_s18, %s3848_s28  ;;  %s3924_s4 = smov [#allocation7]  }
  0x4c   : > { %s3093_s29 = sadd.s32 4294967292, %s149_s12  ;;  %v788_v30 = vsub.f32 %v4092_v18, %v787_v24  ;;  %v795_v31 = vsub.f32 %v4094_v19, %v794_v25  ;;  %v3595_v55 = vpack.c.bf16 %v794_v25, %v787_v24  ;;  %v4170_v0 = vsub.f32 %v184_v56, %v1200_v60  ;;  %s3852_s5 = sshll.u32 %s3924_s4, 4  ;;  %s3853_s5 = int_to_ptr.vmem [resolvable:$false] %s3852_s5 }
  0x4d   : > { %v151_v11 = vstv %s3093_s29  ;;  %v287_v32 = vand.u32 4294901760, %v286_v26  ;;  %v294_v33 = vand.u32 4294901760, %v293_v27  ;;  %v1295_v2 = vsub.f32 %v185_v57, %v1203_v61  ;;  %s3092_s15 = sadd.s32 4294967292, %s146_s13  ;;  %p3850_p1 = pnand %p3849_p9, %p4405_p0 }
  0x4e   : > { %v152_v13 = vadd.s32 %v151_v11, %v4073_v1  ;;  %v153_v17 = vadd.s32 %v151_v11, %v4079_v5  ;;  %v789_v37 = vand.u32 4294901760, %v788_v30  ;;  %v796_v38 = vand.u32 4294901760, %v795_v31  ;;  %s3854_s6 = scalar_lea.vmem %s3853_s5, 2048  ;;  %p3855_p11 = scmp.lt.s32.totalorder %s4348_s18, %s3853_s5 }
  0x4f   : > { %v3559_v40 = vpack.c.bf16 %v294_v33, %v287_v32  ;;  %v1790_v3 = vsub.f32 %v186_v58, %v1702_v62  ;;  %v1797_v4 = vsub.f32 %v187_v59, %v1705_v63  ;;  %v1289_v6 = vand.u32 4294901760, %v4170_v0  ;;  %p3851_p2 = pneg %p3850_p1  ;;  %p3856_p13 = scmp.lt.s32.totalorder %s3854_s6, %s3848_s28 }
  0x50   : > { %vm154_vm1 = vcmp.gt.s32.totalorder %v152_v13, 0  ;;  %vm156_vm2 = vcmp.gt.s32.totalorder %v153_v17, 0  ;;  %v3583_v44 = vpack.c.bf16 %v796_v38, %v789_v37  ;;  %v1296_v7 = vand.u32 4294901760, %v1295_v2 }
  0x51   : > { %v155_v23 = vsel %vm154_vm1, %v152_v13, 0  ;;  %v157_v28 = vsel %vm156_vm2, %v153_v17, 0  ;;  %3560 = vmatprep.subr.bf16.mxu0 %v3559_v40  ;;  %v1791_v8 = vand.u32 4294901760, %v1790_v3  ;;  %v1798_v9 = vand.u32 4294901760, %v1797_v4  ;;  %p3857_p3 = por %p3856_p13, %p3855_p11 }
  0x52   : > { %vm158_vm3 = vcmp.lt.s32.totalorder %v155_v23, 15  ;;  %vm160_vm4 = vcmp.lt.s32.totalorder %v157_v28, 15  ;;  %3584 = vmatprep.subr.bf16.mxu1 %v3583_v44  ;;  %v1290_v10 = vsub.f32 %v4170_v0, %v1289_v6  ;;  %v1297_v11 = vsub.f32 %v1295_v2, %v1296_v7 }
  0x53   : > { %v159_v29 = vsel %vm158_vm3, %v155_v23, 15  ;;  %v161_v34 = vsel %vm160_vm4, %v157_v28, 15  ;;  %v4182_v13 = vpack.c.bf16 %v1203_v61, %v1200_v60  ;;  %v4184_v14 = vpack.c.bf16 %v1705_v63, %v1702_v62  ;;  %p3858_p5 = pnand %p3857_p3, %p3851_p2 }
  0x54   : > { %vm162_vm5 = vcmp.eq.s32.totalorder %v4097_v20, %v159_v29  ;;  %vm163_vm6 = vcmp.eq.s32.totalorder %v4097_v20, %v161_v34  ;;  %v1792_v15 = vsub.f32 %v1790_v3, %v1791_v8  ;;  %v1799_v17 = vsub.f32 %v1797_v4, %v1798_v9 }
  0x55   : > { %v4112_v36 = vsel %vm162_vm5, 1.0, %v3922_v35  ;;  %v4118_v41 = vsel %vm163_vm6, 1.0, %v3922_v35  ;;  %v1291_v18 = vand.u32 4294901760, %v1290_v10  ;;  %v1298_v19 = vand.u32 4294901760, %v1297_v11 }
  0x56   : > { %v190_v39 = vsel %vm188_vm0, %v4112_v36, 0  ;;  %v193_v43 = vsel %vm188_vm0, %v4118_v41, 0  ;;  %v1793_v21 = vand.u32 4294901760, %v1792_v15  ;;  %v1800_v22 = vand.u32 4294901760, %v1799_v17 }
  0x57   : > { %v4120_v42 = vsub.f32 %v190_v39, %v190_v39  ;;  %v4124_v45 = vsub.f32 %v193_v43, %v193_v43  ;;  %v3607_v23 = vpack.c.bf16 %v1298_v19, %v1291_v18  ;;  %v3619_v25 = vpack.c.bf16 %v1296_v7, %v1289_v6 }
  0x58   : > { %v3631_v24 = vpack.c.bf16 %v1800_v22, %v1793_v21  ;;  %v3643_v26 = vpack.c.bf16 %v1798_v9, %v1791_v8  ;;  %v168_v27 = vstv %s3092_s15  ;;  %v3923_v32 = vmov 1.0|1.0  }
  0x59   : > { %v4127_v46 = vand.u32 4294901760, %v4120_v42  ;;  %v4130_v47 = vand.u32 4294901760, %v4124_v45  ;;  %v169_v28 = vadd.s32 %v168_v27, %v4097_v20 }
  0x5b   : > { %v265_v48 = vsub.f32 %v4120_v42, %v4127_v46  ;;  %v275_v49 = vsub.f32 %v4124_v45, %v4130_v47  ;;  %vm170_vm7 = vcmp.gt.s32.totalorder %v169_v28, 0 }
  0x5c   : > { %v171_v29 = vsel %vm170_vm7, %v169_v28, 0 }
  0x5d   : > { %v4136_v50 = vand.u32 4294901760, %v265_v48  ;;  %v4138_v51 = vand.u32 4294901760, %v275_v49  ;;  %vm172_vm8 = vcmp.lt.s32.totalorder %v171_v29, 15 }
  0x5e   : > { %v173_v30 = vsel %vm172_vm8, %v171_v29, 15 }
  0x5f   : > { %3295 = vmatprep.mubr.f32.mxu0 %v4136_v50  ;;  %3337 = vmatprep.mubr.f32.mxu1 %v4136_v50  ;;  %vm174_vm9 = vcmp.eq.s32.totalorder %v4073_v1, %v173_v30  ;;  %vm175_vm10 = vcmp.eq.s32.totalorder %v4079_v5, %v173_v30 }
  0x60   : > { %3296 = vmatmul.mubr.f32.vlgmr.msra.gmra.mrb[0].mxu0 %v4138_v51  ;;  %3338 = vmatmul.mubr.f32.vlgmr.msra.gmra.mrb[0].mxu1 %v4138_v51  ;;  %vm4254_vm11 = vmpackc.low %vm175_vm10, %vm174_vm9  ;;  %v3096_v1 = vsel %vm174_vm9, 1.0, %v3922_v35  ;;  %v3097_v5 = vsel %vm175_vm10, 1.0, %v3922_v35 }
  0x61   : > { %3562 = vmatpush3.bf16.msra.mxu0 %v3559_v40  ;;  %3586 = vmatpush3.bf16.msra.mxu1 %v3583_v44  ;;  %v2376_v20 = vsub.f32 %v3096_v1, %v3096_v1  ;;  %v2383_v33 = vsub.f32 %v3097_v5, %v3097_v5 }
  0x62   : > { %3302 = vmatprep.mubr.msk.f32.mxu0 %vm188_vm0, %v4112_v36  ;;  %3564 = vmatprep.subr.bf16.mxu0 %v3563_v52 }
  0x63   : > { %3344 = vmatprep.mubr.msk.f32.mxu1 %vm188_vm0, %v4112_v36  ;;  %3588 = vmatprep.subr.bf16.mxu1 %v3587_v53  ;;  %v2377_v34 = vand.u32 4294901760, %v2376_v20  ;;  %v4272_v43 = vpack.c.bf16 %v2383_v33, %v2376_v20 }
  0x65   : > { %v2378_v37 = vsub.f32 %v2376_v20, %v2377_v34 }
  0x67   : > { %v2379_v40 = vand.u32 4294901760, %v2378_v37 }
  0x68   : > { %3303 = vmatmul.mubr.msk.f32.vlgmr.msra.gmra.mrb[0].mxu0 %vm188_vm0, %v4118_v41  ;;  %3345 = vmatmul.mubr.msk.f32.vlgmr.msra.gmra.mrb[0].mxu1 %vm188_vm0, %v4118_v41 }
  0x69   : > { %3566 = vmatpush3.bf16.msra.mxu0 %v3563_v52  ;;  %3590 = vmatpush3.bf16.msra.mxu1 %v3587_v53 }
  0x6a   : > { %3309 = vmatprep.mubr.f32.mxu0 %v4120_v42  ;;  %3568 = vmatprep.subr.bf16.mxu0 %v4082_v12 }
  0x6b   : > { %3351 = vmatprep.mubr.f32.mxu1 %v4120_v42  ;;  %3592 = vmatprep.subr.bf16.mxu1 %v4089_v16 }
  0x70   : > { %3310 = vmatmul.mubr.f32.vlgmr.msra.gmra.mrb[0].mxu0 %v4124_v45  ;;  %3352 = vmatmul.mubr.f32.vlgmr.msra.gmra.mrb[0].mxu1 %v4124_v45 }
  0x71   : > { %3570 = vmatpush3.bf16.msra.mxu0 %v4082_v12  ;;  %3594 = vmatpush3.bf16.msra.mxu1 %v4089_v16 }
  0x72   : > { %3316 = vmatprep.mubr.f32.mxu0 %v4127_v46  ;;  %3572 = vmatprep.subr.bf16.mxu0 %v3571_v54 }
  0x73   : > { %3358 = vmatprep.mubr.f32.mxu1 %v4127_v46  ;;  %3596 = vmatprep.subr.bf16.mxu1 %v3595_v55 }
  0x78   : > { %3317 = vmatmul.mubr.f32.vlgmr.msra.gmra.mrb[0].mxu0 %v4130_v47  ;;  %3359 = vmatmul.mubr.f32.vlgmr.msra.gmra.mrb[0].mxu1 %v4130_v47 }
  0x79   : > { %3574 = vmatpush3.bf16.msra.mxu0 %v3571_v54  ;;  %3598 = vmatpush3.bf16.msra.mxu1 %v3595_v55 }
  0x7a   : > { %3323 = vmatprep.mubr.msk.f32.mxu0 %vm188_vm0, %v4112_v36  ;;  %3576 = vmatprep.subr.bf16.mxu0 %v4082_v12 }
  0x7b   : > { %3365 = vmatprep.mubr.msk.f32.mxu1 %vm188_vm0, %v4112_v36  ;;  %3600 = vmatprep.subr.bf16.mxu1 %v4089_v16 }
  0x80   : > { %3324 = vmatmul.mubr.msk.f32.vlgmr.msra.gmra.mrb[0].mxu0 %vm188_vm0, %v4118_v41  ;;  %3366 = vmatmul.mubr.msk.f32.vlgmr.msra.gmra.mrb[0].mxu1 %vm188_vm0, %v4118_v41 }
  0x81   : > { %3578 = vmatpush3.bf16.msra.mxu0 %v4082_v12  ;;  %3602 = vmatpush3.bf16.msra.mxu1 %v4089_v16  ;;  %v3611_v12 = vpack.c.bf16 %v1295_v2, %v4170_v0  ;;  %v3635_v16 = vpack.c.bf16 %v1797_v4, %v1790_v3 }
  0x82   : > { %3330 = vmatprep.mubr.msk.f32.mxu0 %vm188_vm0, %v4112_v36  ;;  %3372 = vmatprep.mubr.msk.f32.mxu1 %vm188_vm0, %v4112_v36 }
  0x83   : > { %3604 = vmatprep.subr.bf16.mxu0 %v4182_v13  ;;  %3628 = vmatprep.subr.bf16.mxu1 %v4184_v14 }
  0x88   : > { %3331 = vmatmul.mubr.msk.f32.vlgmr.msra.gmra.mrb[0].mxu0 %vm188_vm0, %v4118_v41  ;;  %3373 = vmatmul.mubr.msk.f32.vlgmr.msra.gmra.mrb[0].mxu1 %vm188_vm0, %v4118_v41 }
  0x89   : > { %3606 = vmatpush3.bf16.msra.mxu0 %v4182_v13  ;;  %3630 = vmatpush3.bf16.msra.mxu1 %v4184_v14 }
  0x8a   : > { %3379 = vmatprep.mubr.f32.mxu0 %v4136_v50  ;;  %3608 = vmatprep.subr.bf16.mxu0 %v3607_v23 }
  0x8b   : > { %3421 = vmatprep.mubr.f32.mxu1 %v4136_v50  ;;  %3632 = vmatprep.subr.bf16.mxu1 %v3631_v24 }
  0x8c   : > { %3380 = vmatmul.mubr.f32.vlgmr.msra.gmra.mrb[2].mxu0 %v4138_v51  ;;  %3422 = vmatmul.mubr.f32.vlgmr.msra.gmra.mrb[2].mxu1 %v4138_v51 }
  0x8d   : > { %3610 = vmatpush3.bf16.msra.mxu0 %v3607_v23  ;;  %3634 = vmatpush3.bf16.msra.mxu1 %v3631_v24 }
  0x8e   : > { %3386 = vmatprep.mubr.msk.f32.mxu0 %vm188_vm0, %v4112_v36  ;;  %3612 = vmatprep.subr.bf16.mxu0 %v3611_v12 }
  0x8f   : > { %3428 = vmatprep.mubr.msk.f32.mxu1 %vm188_vm0, %v4112_v36  ;;  %3636 = vmatprep.subr.bf16.mxu1 %v3635_v16 }
  0x94   : > { %3387 = vmatmul.mubr.msk.f32.vlgmr.msra.gmra.mrb[2].mxu0 %vm188_vm0, %v4118_v41  ;;  %3429 = vmatmul.mubr.msk.f32.vlgmr.msra.gmra.mrb[2].mxu1 %vm188_vm0, %v4118_v41 }
  0x95   : > { %3614 = vmatpush3.bf16.msra.mxu0 %v3611_v12  ;;  %3638 = vmatpush3.bf16.msra.mxu1 %v3635_v16 }
  0x96   : > { %3393 = vmatprep.mubr.f32.mxu0 %v4120_v42  ;;  %3616 = vmatprep.subr.bf16.mxu0 %v4182_v13 }
  0x97   : > { %3435 = vmatprep.mubr.f32.mxu1 %v4120_v42  ;;  %3640 = vmatprep.subr.bf16.mxu1 %v4184_v14 }
  0x9c   : > { %3394 = vmatmul.mubr.f32.vlgmr.msra.gmra.mrb[2].mxu0 %v4124_v45  ;;  %3436 = vmatmul.mubr.f32.vlgmr.msra.gmra.mrb[2].mxu1 %v4124_v45 }
  0x9d   : > { %3618 = vmatpush3.bf16.msra.mxu0 %v4182_v13  ;;  %3642 = vmatpush3.bf16.msra.mxu1 %v4184_v14 }
  0x9e   : > { %3400 = vmatprep.mubr.f32.mxu0 %v4127_v46  ;;  %3620 = vmatprep.subr.bf16.mxu0 %v3619_v25 }
  0x9f   : > { %3442 = vmatprep.mubr.f32.mxu1 %v4127_v46  ;;  %3644 = vmatprep.subr.bf16.mxu1 %v3643_v26 }
  0xa4   : > { %3401 = vmatmul.mubr.f32.vlgmr.msra.gmra.mrb[2].mxu0 %v4130_v47  ;;  %3443 = vmatmul.mubr.f32.vlgmr.msra.gmra.mrb[2].mxu1 %v4130_v47 }
  0xa5   : > { %3622 = vmatpush3.bf16.msra.mxu0 %v3619_v25  ;;  %3646 = vmatpush3.bf16.msra.mxu1 %v3643_v26 }
  0xa6   : > { %3407 = vmatprep.mubr.msk.f32.mxu0 %vm188_vm0, %v4112_v36  ;;  %3624 = vmatprep.subr.bf16.mxu0 %v4182_v13 }
  0xa7   : > { %3449 = vmatprep.mubr.msk.f32.mxu1 %vm188_vm0, %v4112_v36  ;;  %3648 = vmatprep.subr.bf16.mxu1 %v4184_v14 }
  0xac   : > { %3408 = vmatmul.mubr.msk.f32.vlgmr.msra.gmra.mrb[2].mxu0 %vm188_vm0, %v4118_v41  ;;  %3450 = vmatmul.mubr.msk.f32.vlgmr.msra.gmra.mrb[2].mxu1 %vm188_vm0, %v4118_v41 }
  0xad   : > { %3626 = vmatpush3.bf16.msra.mxu0 %v4182_v13  ;;  %3650 = vmatpush3.bf16.msra.mxu1 %v4184_v14 }
  0xae   : > { %3414 = vmatprep.mubr.msk.f32.mxu0 %vm188_vm0, %v4112_v36  ;;  %3456 = vmatprep.mubr.msk.f32.mxu1 %vm188_vm0, %v4112_v36  ;;  %v2384_v36 = vand.u32 4294901760, %v2383_v33 }
  0xaf   : > { %3664 = vmatprep.subr.msk.bf16.mxu0 %vm4254_vm11, %v3923_v32  ;;  %3652 = vmatprep.subr.msk.bf16.mxu1 %vm4254_vm11, %v3923_v32 }
  0xb0   : > { %v2385_v38 = vsub.f32 %v2383_v33, %v2384_v36  ;;  %v3667_v39 = vpack.c.bf16 %v2384_v36, %v2377_v34 }
  0xb4   : > { %3415 = vmatmul.mubr.msk.f32.vlgmr.msra.gmra.mrb[2].mxu0 %vm188_vm0, %v4118_v41  ;;  %3457 = vmatmul.mubr.msk.f32.vlgmr.msra.gmra.mrb[2].mxu1 %vm188_vm0, %v4118_v41  ;;  %v2386_v41 = vand.u32 4294901760, %v2385_v38 }
  0xb5   : > { %3666 = vmatpush3.bf16.msk.msra.mxu0 %vm4254_vm11, %v3923_v32  ;;  %3654 = vmatpush3.bf16.msk.msra.mxu1 %vm4254_vm11, %v3923_v32 }
  0xb6   : > { %3668 = vmatprep.subr.bf16.mxu0 %v3667_v39  ;;  %v3655_v42 = vpack.c.bf16 %v2386_v41, %v2379_v40 }
  0xb8   : > { %3656 = vmatprep.subr.bf16.mxu1 %v3655_v42 }
 0x15b   : > { %v3332_v44 = vpop.f32.mrb[0].mxu0  ;;  %v3374_v45 = vpop.f32.mrb[0].mxu1 }
 0x15c   : > { %v2207_v46 = vsel %vm188_vm0, %v3332_v44, 0  ;;  %v2213_v35 = vsel %vm188_vm0, %v3374_v45, 0  ;;  %v687_v47 = vpop.f32.mrb[1].mxu0  ;;  %v1189_v48 = vpop.f32.mrb[1].mxu1 }
 0x15d   : > { %v4276_v49 = vand.u32 4294901760, %v2207_v46  ;;  %v4278_v50 = vand.u32 4294901760, %v2213_v35  ;;  %v2204_v51 = vsel %vm188_vm0, %v687_v47, 0  ;;  %v2210_v52 = vsel %vm188_vm0, %v1189_v48, 0 }
 0x15e   : > { %v4282_v53 = vand.u32 4294901760, %v2204_v51  ;;  %v4284_v54 = vand.u32 4294901760, %v2210_v52 }
 0x15f   : > { %v4287_v55 = vsub.f32 %v2207_v46, %v4276_v49  ;;  %v4290_v56 = vsub.f32 %v2213_v35, %v4278_v50 }
 0x160   : > { %v4293_v57 = vsub.f32 %v2204_v51, %v4282_v53  ;;  %v4296_v58 = vsub.f32 %v2210_v52, %v4284_v54 }
 0x161   : > { %v2306_v59 = vand.u32 4294901760, %v4287_v55  ;;  %v2326_v63 = vand.u32 4294901760, %v4290_v56 }
 0x162   : > { %v2296_v60 = vand.u32 4294901760, %v4293_v57  ;;  %v2316_v61 = vand.u32 4294901760, %v4296_v58 }
 0x163   : > { %v2307_v62 = vsub.f32 %v4287_v55, %v2306_v59  ;;  %v2327_v6 = vsub.f32 %v4290_v56, %v2326_v63 }
 0x164   : > { %3511 = vmatprep.mubr.f32.mxu0 %v2296_v60  ;;  %v2297_v0 = vsub.f32 %v4293_v57, %v2296_v60  ;;  %v2317_v2 = vsub.f32 %v4296_v58, %v2316_v61 }
 0x165   : > { %3512 = vmatmul.mubr.f32.vlgmr.msra.gmra.mrb[4].mxu0 %v2306_v59  ;;  %v2308_v4 = vand.u32 4294901760, %v2307_v62  ;;  %v2328_v8 = vand.u32 4294901760, %v2327_v6 }
 0x166   : > { %3514 = vmatprep.mubr.f32.mxu0 %v2316_v61  ;;  %v2298_v3 = vand.u32 4294901760, %v2297_v0  ;;  %3670 = vmatpush3.bf16.msra.mxu0 %v3667_v39  ;;  %v2318_v7 = vand.u32 4294901760, %v2317_v2 }
 0x167   : > { %3672 = vmatprep.subr.msk.bf16.mxu0 %vm4254_vm11, %v3923_v32 }
 0x168   : > { %3463 = vmatprep.mubr.f32.mxu1 %v2298_v3 }
 0x169   : > { %3464 = vmatmul.mubr.f32.vlgmr.msra.gmra.mrb[4].mxu1 %v2308_v4  ;;  %3515 = vmatmul.mubr.f32.gmra.mrb[6].mxu0 %v2326_v63 }
 0x16a   : > { %3466 = vmatprep.mubr.f32.mxu1 %v2318_v7  ;;  %3658 = vmatpush3.bf16.msra.mxu1 %v3655_v42 }
 0x16b   : > { %3660 = vmatprep.subr.bf16.mxu1 %v4272_v43 }
 0x16d   : > { %3467 = vmatmul.mubr.f32.gmra.mrb[6].mxu1 %v2328_v8 }
 0x187   : > { %v3416_v9 = vpop.f32.mrb[2].mxu0  ;;  %v3458_v10 = vpop.f32.mrb[2].mxu1 }
 0x188   : > { %v2219_v11 = vsel %vm188_vm0, %v3416_v9, 0  ;;  %v2225_v13 = vsel %vm188_vm0, %v3458_v10, 0  ;;  %v1691_v14 = vpop.f32.mrb[3].mxu0  ;;  %v2193_v15 = vpop.f32.mrb[3].mxu1 }
 0x189   : > { %v2344_v17 = vand.u32 4294901760, %v2219_v11  ;;  %v2364_v18 = vand.u32 4294901760, %v2225_v13  ;;  %v2216_v19 = vsel %vm188_vm0, %v1691_v14, 0  ;;  %v2222_v21 = vsel %vm188_vm0, %v2193_v15, 0 }
 0x18a   : > { %v2334_v22 = vand.u32 4294901760, %v2216_v19  ;;  %v2354_v23 = vand.u32 4294901760, %v2222_v21 }
 0x18b   : > { %v2345_v24 = vsub.f32 %v2219_v11, %v2344_v17  ;;  %v2365_v12 = vsub.f32 %v2225_v13, %v2364_v18 }
 0x18c   : > { %v2335_v16 = vsub.f32 %v2216_v19, %v2334_v22  ;;  %v2355_v25 = vsub.f32 %v2222_v21, %v2354_v23 }
 0x18d   : > { %v2346_v26 = vand.u32 4294901760, %v2345_v24  ;;  %v2366_v30 = vand.u32 4294901760, %v2365_v12 }
 0x18e   : > { %v2336_v27 = vand.u32 4294901760, %v2335_v16  ;;  %v2356_v28 = vand.u32 4294901760, %v2355_v25 }
 0x18f   : > { %v2347_v29 = vsub.f32 %v2345_v24, %v2346_v26  ;;  %v2367_v34 = vsub.f32 %v2365_v12, %v2366_v30 }
 0x190   : > { %3517 = vmatprep.mubr.f32.mxu0 %v2336_v27  ;;  %v2337_v1 = vsub.f32 %v2335_v16, %v2336_v27  ;;  %v2357_v5 = vsub.f32 %v2355_v25, %v2356_v28 }
 0x191   : > { %3518 = vmatmul.mubr.f32.gmra.mrb[8].mxu0 %v2346_v26  ;;  %v2348_v33 = vand.u32 4294901760, %v2347_v29  ;;  %v2368_v37 = vand.u32 4294901760, %v2367_v34 }
 0x192   : > { %3520 = vmatprep.mubr.f32.mxu0 %v2356_v28  ;;  %v2338_v20 = vand.u32 4294901760, %v2337_v1  ;;  %v2358_v36 = vand.u32 4294901760, %v2357_v5 }
 0x194   : > { %3469 = vmatprep.mubr.f32.mxu1 %v2338_v20 }
 0x195   : > { %3470 = vmatmul.mubr.f32.gmra.mrb[8].mxu1 %v2348_v33  ;;  %3521 = vmatmul.mubr.f32.gmra.mrb[10].mxu0 %v2366_v30 }
 0x196   : > { %3472 = vmatprep.mubr.f32.mxu1 %v2358_v36  ;;  %3527 = vmatprep.mubr.f32.mxu0 %v4282_v53 }
 0x199   : > { %3473 = vmatmul.mubr.f32.gmra.mrb[10].mxu1 %v2368_v37  ;;  %3528 = vmatmul.mubr.f32.vlgmr.msra.gmra.mrb[4].mxu0 %v4276_v49 }
 0x19a   : > { %3479 = vmatprep.mubr.f32.mxu1 %v4282_v53  ;;  %3530 = vmatprep.mubr.f32.mxu0 %v4284_v54 }
 0x19b   : > { %3674 = vmatpush3.bf16.msk.msra.mxu0 %vm4254_vm11, %v3923_v32 }
 0x19d   : > { %3480 = vmatmul.mubr.f32.vlgmr.msra.gmra.mrb[4].mxu1 %v4276_v49  ;;  %3531 = vmatmul.mubr.f32.gmra.mrb[6].mxu0 %v4278_v50 }
 0x19e   : > { %3662 = vmatpush3.bf16.msra.mxu1 %v4272_v43  ;;  %3482 = vmatprep.mubr.f32.mxu1 %v4284_v54 }
 0x19f   : > { %3533 = vmatprep.mubr.f32.mxu0 %v2334_v22 }
 0x1a1   : > { %3483 = vmatmul.mubr.f32.gmra.mrb[6].mxu1 %v4278_v50  ;;  %3534 = vmatmul.mubr.f32.gmra.mrb[8].mxu0 %v2344_v17 }
 0x1a2   : > { %3485 = vmatprep.mubr.f32.mxu1 %v2334_v22  ;;  %3536 = vmatprep.mubr.f32.mxu0 %v2354_v23 }
 0x1a5   : > { %3486 = vmatmul.mubr.f32.gmra.mrb[8].mxu1 %v2344_v17  ;;  %3537 = vmatmul.mubr.f32.gmra.mrb[10].mxu0 %v2364_v18 }
 0x1a6   : > { %3488 = vmatprep.mubr.f32.mxu1 %v2354_v23  ;;  %3543 = vmatprep.mubr.f32.mxu0 %v4282_v53 }
 0x1a9   : > { %3489 = vmatmul.mubr.f32.gmra.mrb[10].mxu1 %v2364_v18  ;;  %3544 = vmatmul.mubr.f32.vlgmr.msra.gmra.mrb[4].mxu0 %v4276_v49 }
 0x1aa   : > { %3495 = vmatprep.mubr.f32.mxu1 %v4293_v57  ;;  %3546 = vmatprep.mubr.f32.mxu0 %v4284_v54 }
 0x1ad   : > { %3496 = vmatmul.mubr.f32.vlgmr.msra.gmra.mrb[4].mxu1 %v4287_v55  ;;  %3547 = vmatmul.mubr.f32.gmra.mrb[6].mxu0 %v4278_v50 }
 0x1ae   : > { %3498 = vmatprep.mubr.f32.mxu1 %v4296_v58  ;;  %3549 = vmatprep.mubr.f32.mxu0 %v2334_v22 }
 0x1b1   : > { %3499 = vmatmul.mubr.f32.gmra.mrb[6].mxu1 %v4290_v56  ;;  %3550 = vmatmul.mubr.f32.gmra.mrb[8].mxu0 %v2344_v17 }
 0x1b2   : > { %3501 = vmatprep.mubr.f32.mxu1 %v2335_v16  ;;  %3552 = vmatprep.mubr.f32.mxu0 %v2354_v23 }
 0x1b5   : > { %3502 = vmatmul.mubr.f32.gmra.mrb[8].mxu1 %v2345_v24  ;;  %3553 = vmatmul.mubr.f32.gmra.mrb[10].mxu0 %v2364_v18 }
 0x1b6   : > { %3504 = vmatprep.mubr.f32.mxu1 %v2355_v25 }
 0x1b9   : > { %3505 = vmatmul.mubr.f32.gmra.mrb[10].mxu1 %v2365_v12 }
 0x27c   : > { %v3545_v31 = vpop.f32.mrb[4].mxu0 }
 0x27d   : > { %v2941_v32 = vpop.f32.mrb[5].mxu0 }
 0x280   : > { %v3497_v38 = vpop.f32.mrb[4].mxu1  ;;  %v3548_v39 = vpop.f32.mrb[6].mxu0 }
 0x281   : > { %v3675_v40 = vadd.f32 %v3545_v31, %v3497_v38  ;;  %v2569_v41 = vpop.f32.mrb[5].mxu1  ;;  %v2953_v42 = vpop.f32.mrb[7].mxu0 }
 0x282   : > { %v3676_v43 = vadd.f32 %v2941_v32, %v2569_v41 }
 0x283   : > { %2988 = vst.msk [vmem:[%s139_s16 + $0x8] sm:$0xff] %vm188_vm0, %v3675_v40 }
 0x284   : > { %2987 = vst.msk [vmem:[%s139_s16] sm:$0xff] %vm188_vm0, %v3676_v43  ;;  %v3500_v44 = vpop.f32.mrb[6].mxu1  ;;  %v3551_v45 = vpop.f32.mrb[8].mxu0 }
 0x285   : > { %v3677_v46 = vadd.f32 %v3548_v39, %v3500_v44  ;;  %v2583_v35 = vpop.f32.mrb[7].mxu1  ;;  %v2965_v47 = vpop.f32.mrb[9].mxu0 }
 0x286   : > { %v3678_v48 = vadd.f32 %v2953_v42, %v2583_v35 }
 0x287   : > { %2990 = vst.msk [vmem:[%s139_s16 + $0x18] sm:$0xff] %vm188_vm0, %v3677_v46 }
 0x288   : > { %2989 = vst.msk [vmem:[%s139_s16 + $0x10] sm:$0xff] %vm188_vm0, %v3678_v48  ;;  %v3503_v49 = vpop.f32.mrb[8].mxu1  ;;  %v3554_v50 = vpop.f32.mrb[10].mxu0 }
 0x289   : > { %v3679_v51 = vadd.f32 %v3551_v45, %v3503_v49  ;;  %v2597_v52 = vpop.f32.mrb[9].mxu1  ;;  %v2977_v53 = vpop.f32.mrb[11].mxu0 }
 0x28a   : > { %v3680_v54 = vadd.f32 %v2965_v47, %v2597_v52 }
 0x28b   : > { %2992 = vst.msk [vmem:[%s139_s16 + $0x28] sm:$0xff] %vm188_vm0, %v3679_v51 }
 0x28c   : > { %2991 = vst.msk [vmem:[%s139_s16 + $0x20] sm:$0xff] %vm188_vm0, %v3680_v54  ;;  %v3506_v55 = vpop.f32.mrb[10].mxu1 }
 0x28d   : > { %v3681_v56 = vadd.f32 %v3554_v50, %v3506_v55  ;;  %v2611_v57 = vpop.f32.mrb[11].mxu1 }
 0x28e   : > { %v3682_v58 = vadd.f32 %v2977_v53, %v2611_v57 }
 0x28f   : > { %2994 = vst.msk [vmem:[%s139_s16 + $0x38] sm:$0xff] %vm188_vm0, %v3681_v56 }
 0x290   : > { %2993 = vst.msk [vmem:[%s139_s16 + $0x30] sm:$0xff] %vm188_vm0, %v3682_v58 }
 0x291   : > { %3861 = shalt.err (!%p3858_p5)
}
 0x292   : > { %s3862_s8 = scalar_lea.hbm %s4346_s26, 1024  ;;  %s3866_s9 = scalar_lea.hbm %s4396_s2, 2048 }
 0x293   : > { %p3863_p7 = scmp.ne.s32.totalorder %s4346_s26, %s3862_s8  ;;  %p3867_p12 = scmp.lt.u32.totalorder %s4346_s26, %s4396_s2 }
 0x294   : > { %p3868_p4 = scmp.lt.u32.totalorder %s3866_s9, %s3862_s8  ;;  %p3870_p9 = scmp.lt.u32.totalorder %s3862_s8, %s4346_s26 }
 0x295   : > { %p3864_p8 = pnand %p3863_p7, %p4405_p0 }
 0x296   : > { %p3869_p6 = por %p3868_p4, %p3867_p12 }
 0x297   : > { %p3865_p10 = pneg %p3864_p8 }
 0x298   : > { %p3871_p1 = por %p3870_p9, %p3869_p6 }
 0x29a   : > { %p3872_p2 = pnand %p3871_p1, %p3865_p10 }
 0x29c   : > { %3875 = shalt.err (!%p3872_p2)
}
 0x29d   : > { %s3925_s29 = smov 128   ;;  %s3926_s13 = smov 8  }
 0x29e   : > { %3757 = dma.vmem_to_hbm [thread:$0]  (%p4405_p0), %s4348_s18, 1024, %s4346_s26, %s2996_s0, %s3925_s29, %s3925_s29, %s3926_s13  }
 0x29f PF: > { %s3024_s15 = sand.u32 1, %s3904_s19   ;;  %p4406_p11 = scmp.ne.s32.totalorder %s4401_s3, 0 }
 0x2a0   : > { %p4407_p13 = scmp.ge.s32.totalorder %s3916_s22, 2  ;;  %s3025_s16 = scalar_lea.sflag [#allocation6], %s3024_s15 }
 0x2a2   : > { %p3764_p3 = pnand %p4407_p13, %p4406_p11 }
 0x2a4   : > { %3899 = dma.done.wait (!%p3764_p3), %s3025_s16, 1024  }
 0x2a5   : > { %3901 = vsyncadd (!%p3764_p3), %s3025_s16, 4294966272  ;;  %p19_p5 = scmp.ge.s32.totalorder %s3979_s24, 4   ;;  %s4408_s19 = smov %s3908_s20 }
 0x2a6   : > { %s4409_s20 = smov %s3912_s21  ;;  %s4410_s21 = smov %s3991_s27 }
 0x2a7   : > { %s4411_s22 = smov %s3979_s24  ;;  %21 = sbr.rel (!%p19_p5) target bundleno = 17 (0x11), region = 69 }
 0x2ae   :  { %3030 = vsyncpa [#allocation5], 1 }
 0x2af   :  { %3032 = vsyncpa [#allocation5 + $0x1], 1 }
 0x2b0   :  { %3033 = vsyncpa [#allocation6], 1 }
 0x2b1   :  { %3035 = vsyncpa [#allocation6 + $0x1], 1 }

</bundles_post_ra>
